<compile_context>
chip_gen: v6e
topology: v6e:2x2x1
jax: 0.10.0
libtpu: 0.0.40
codegen_flags: <defaults>
</compile_context>

<pallas_src>
import jax
import jax.numpy as jnp
from jax.experimental import pallas as pl
from jax.experimental.pallas import tpu as pltpu


def _round_up(x, m):
    return ((x + m - 1) // m) * m


def _choose_tile(dim, cap, align):
    """Pad `dim` to `align`, then split into equal aligned tiles of size <= cap.

    Returns (tile, padded_dim, num_blocks) with tile * num_blocks == padded_dim,
    tile % align == 0, and padded_dim - dim < num_blocks * align.
    """
    padded0 = _round_up(dim, align)
    nblocks = -(-padded0 // cap)                     # ceil div
    tile = _round_up(-(-padded0 // nblocks), align)  # ceil div, re-aligned
    return tile, tile * nblocks, nblocks


# ---------------------------------------------------------------------------
# Pallas kernel: fused tiled (x @ w + b)
#   x: (M, K)   w: (K, N)  (PyTorch weight transposed)   b: (1, N) f32
# ---------------------------------------------------------------------------
def _linear_kernel(x_ref, w_ref, b_ref, o_ref, acc_ref):
    k = pl.program_id(2)

    # Fold the bias into the accumulator init (removes the epilogue add).
    @pl.when(k == 0)
    def _():
        acc_ref[...] = jnp.broadcast_to(
            b_ref[...].astype(jnp.float32), acc_ref.shape)

    acc_ref[...] += jnp.dot(x_ref[...], w_ref[...],
                            preferred_element_type=jnp.float32)

    @pl.when(k == pl.num_programs(2) - 1)
    def _():
        o_ref[...] = acc_ref[...].astype(o_ref.dtype)


# ---------------------------------------------------------------------------
# Param preparation (runs ONCE, outside the forward hot path)
# ---------------------------------------------------------------------------
def prepare_linear(w, b, *, weight_dtype=jnp.bfloat16, tk_cap=2048, tn_cap=512):
    """Pre-pad + pre-cast a linear layer's weight/bias and pick its K/N tiles.

    w: (K, N) -- PyTorch weight already transposed to (in, out).
    b: (N,)
    Padding + dtype cast happen here (not per forward call), so the Pallas
    kernel is the only consumer of weight HBM bandwidth at run time.
    """
    K, N = w.shape
    tk, Kp, _ = _choose_tile(K, tk_cap, 128)
    tn, Np, _ = _choose_tile(N, tn_cap, 128)
    wp = jnp.pad(w, ((0, Kp - K), (0, Np - N))).astype(weight_dtype)
    bp = jnp.pad(b, (0, Np - N)).astype(jnp.float32).reshape(1, Np)
    return {"w": wp, "b": bp, "k_in": K, "n_out": N, "tk": tk, "tn": tn}


# ---------------------------------------------------------------------------
# Wrapper: x @ w + b with pre-prepared (padded, bf16) weights
# ---------------------------------------------------------------------------
def pallas_linear(x, layer, *, out_dtype=None, tm_cap=512):
    """Compute x @ w + b with a tiled Pallas TPU kernel.

    x: (M, K) activations; `layer` is the dict produced by prepare_linear.
    Only the (small) activation is padded per call; K-tail zeros are inert in
    the reduction, and padded M rows / N cols are sliced off the result.
    """
    M, K = x.shape
    assert K == layer["k_in"], (K, layer["k_in"])
    w, b = layer["w"], layer["b"]
    Kp, Np = w.shape
    tk, tn = layer["tk"], layer["tn"]
    out_dtype = out_dtype or x.dtype

    # Match MXU operand dtypes (no-op for the fc head: feat is emitted bf16).
    if x.dtype != w.dtype:
        x = x.astype(w.dtype)

    tm, Mp, nm = _choose_tile(M, tm_cap, 8)
    nj = Np // tn
    nk = Kp // tk

    # v7x megacore: keep >=2 parallel output blocks when cheaply possible so
    # both TensorCores get a share of the weight stream / compute.
    if nm * nj < 2 and tn % 256 == 0:
        tn //= 2
        nj = Np // tn

    if Mp != M or Kp != K:
        x = jnp.pad(x, ((0, Mp - M), (0, Kp - K)))  # zeros inert in K-reduce

    total_steps = nm * nj * nk
    w_spec_kwargs = {}
    wbuf = 2
    if total_steps >= 3:
        # Weight DMA is the critical stream; a 3-deep buffer hides DMA start
        # latency/jitter for the cost of one extra tk*tn tile of VMEM.
        w_spec_kwargs["pipeline_mode"] = pl.Buffered(3)
        wbuf = 3

    xbytes = jnp.dtype(x.dtype).itemsize
    wbytes = jnp.dtype(w.dtype).itemsize
    obytes = jnp.dtype(out_dtype).itemsize
    vmem_est = (2 * tm * tk * xbytes + wbuf * tk * tn * wbytes
                + 2 * tn * 4 + 2 * tm * tn * obytes + tm * tn * 4)
    assert vmem_est <= 32 * 1024 * 1024, (
        f"tile choice needs ~{vmem_est / 2**20:.1f} MiB VMEM; use smaller tiles")
    # Derived limit (footprint + headroom) instead of a flat 48 MiB; keeps
    # headroom on v7x's 64 MiB while still overriding small scoped defaults.
    vmem_limit = int(min(max(vmem_est + (8 << 20), 16 << 20), 48 << 20))

    out = pl.pallas_call(
        _linear_kernel,
        out_shape=jax.ShapeDtypeStruct((Mp, Np), out_dtype),
        grid_spec=pltpu.PrefetchScalarGridSpec(
            num_scalar_prefetch=0,
            grid=(nm, nj, nk),
            in_specs=[
                pl.BlockSpec((tm, tk), lambda i, j, k: (i, k)),
                pl.BlockSpec((tk, tn), lambda i, j, k: (k, j), **w_spec_kwargs),
                pl.BlockSpec((1, tn), lambda i, j, k: (0, j)),
            ],
            out_specs=pl.BlockSpec((tm, tn), lambda i, j, k: (i, j)),
            scratch_shapes=[pltpu.VMEM((tm, tn), jnp.float32)],
        ),
        compiler_params=pltpu.CompilerParams(
            dimension_semantics=("parallel", "parallel", "arbitrary"),
            vmem_limit_bytes=vmem_limit),
        cost_estimate=pl.CostEstimate(
            flops=2 * Mp * Np * Kp,
            transcendentals=0,
            # Account for operand re-streaming: x is read nj times, w nm times.
            bytes_accessed=(nj * Mp * Kp * xbytes + nm * Kp * Np * wbytes
                            + Mp * Np * obytes + nm * Np * 4)),
    )(x, w, b)

    if Mp != M or Np != layer["n_out"]:
        out = out[:M, :layer["n_out"]]
    return out


# ---------------------------------------------------------------------------
# LinearHead forward
# ---------------------------------------------------------------------------
def linear_head_forward(x_nchw, params):
    """Reproduces LinearHead.forward: feat = net(x); return fc(feat).

    `fix=True` only affects training (no grads / weight init); the forward
    math is identical, so it is reflected purely in the deterministic init.
    """
    # --- backbone `net` (stand-in; the PyTorch module takes it as an arg) ---
    # TODO(synk): the real backbone architecture is unspecified in the module;
    # a global-average-pool + Pallas linear projection stands in for it here.
    pooled = jnp.mean(x_nchw, axis=(2, 3))                           # (N, C)
    # Emit feat directly in bf16: the fc kernel consumes bf16 activations, so
    # this removes an HBM round-trip + a separate cast kernel before fc.
    feat = pallas_linear(pooled, params["net"],
                         out_dtype=jnp.bfloat16)                     # (N, dim_in)

    # --- fc head (the LinearHead-specific hot path, in Pallas) ---
    # TODO(synk): the two linears could be fused into one kernel to skip the
    # HBM round-trip of `feat`; kept separate here for modularity.
    out = pallas_linear(feat, params["fc"],
                        out_dtype=jnp.float32)                       # (N, dim_out)
    return out


def init_raw_params(key, c_in, dim_in, dim_out, fix=True):
    k1, k2 = jax.random.split(key, 2)
    # backbone projection (stand-in)
    net_w = jax.random.normal(k1, (c_in, dim_in), jnp.float32) * 0.05
    net_b = jnp.zeros((dim_in,), jnp.float32)
    # fc: PyTorch stores weight as (dim_out, dim_in); keep it transposed as
    # (dim_in, dim_out) for the (M,K)@(K,N) kernel.
    if fix:
        # self.fc.weight.data.normal_(mean=0.0, std=0.01); bias zeroed
        fc_w = jax.random.normal(k2, (dim_in, dim_out), jnp.float32) * 0.01
    else:
        bound = 1.0 / (dim_in ** 0.5)
        fc_w = jax.random.uniform(k2, (dim_in, dim_out), jnp.float32,
                                  -bound, bound)
    fc_b = jnp.zeros((dim_out,), jnp.float32)
    return {"net_w": net_w, "net_b": net_b, "fc_w": fc_w, "fc_b": fc_b}


def prepare_head_params(raw, weight_dtype=jnp.bfloat16):
    """One-time pad + bf16 cast + tile choice for both linears."""
    return {
        "net": prepare_linear(raw["net_w"], raw["net_b"],
                              weight_dtype=weight_dtype),
        "fc": prepare_linear(raw["fc_w"], raw["fc_b"],
                             weight_dtype=weight_dtype),
    }


if __name__ == "__main__":
    # Small shapes consistent with the module: batch=2, channels=4,
    # spatial=16x16, dim_in=32 (stand-in for 2048), dim_out=16 (for 1000).
    batch, c_in, spatial = 2, 4, 16
    dim_in, dim_out = 32, 16

    key = jax.random.PRNGKey(0)
    kx, kp = jax.random.split(key)
    x = jax.random.normal(kx, (batch, c_in, spatial, spatial), jnp.float32)
    raw = init_raw_params(kp, c_in, dim_in, dim_out, fix=True)
    params = prepare_head_params(raw)          # pad/cast once, not per forward

    out = linear_head_forward(x, params)
    out = jax.block_until_ready(out)
    assert out.shape == (batch, dim_out), out.shape

    # Reference: identical math (bf16 operands, f32 accumulation, bf16 feat)
    # in plain JAX.
    def ref_linear(a, w, b):
        return jnp.dot(a.astype(jnp.bfloat16), w.astype(jnp.bfloat16),
                       preferred_element_type=jnp.float32) + b

    pooled = jnp.mean(x, axis=(2, 3))
    feat_ref = ref_linear(pooled, raw["net_w"],
                          raw["net_b"]).astype(jnp.bfloat16)
    ref = ref_linear(feat_ref, raw["fc_w"], raw["fc_b"])
    max_err = float(jnp.max(jnp.abs(out - ref)))
    assert jnp.allclose(out, ref, atol=1e-4, rtol=1e-3), max_err

    print("KERNEL_OK")
</pallas_src>

<mosaic_0001>
module attributes {stable_mosaic.version = 11 : i64} {
  func.func @_linear_kernel(%arg0: i32, %arg1: i32, %arg2: i32, %arg3: memref<8x128xbf16, #tpu.memory_space<vmem>>, %arg4: memref<128x128xbf16, #tpu.memory_space<vmem>>, %arg5: memref<1x128xf32, #tpu.memory_space<vmem>>, %arg6: memref<8x128xbf16, #tpu.memory_space<vmem>>, %arg7: memref<8x128xf32, #tpu.memory_space<vmem>>) attributes {dimension_semantics = [#tpu.dimension_semantics<parallel>, #tpu.dimension_semantics<parallel>, #tpu.dimension_semantics<arbitrary>], iteration_bounds = array<i64: 1, 1, 1>, scalar_prefetch = 0 : i64, scratch_operands = 1 : i64, tpu.core_type = #tpu.core_type<tc>, window_params = [{transform_indices = @transform_0, window_bounds = array<i64: 8, 128>}, {transform_indices = @transform_1, window_bounds = array<i64: 128, 128>}, {transform_indices = @transform_2, window_bounds = array<i64: 1, 128>}, {transform_indices = @transform_3, window_bounds = array<i64: 8, 128>}]} {
    %c0_i32 = arith.constant 0 : i32
    %0 = arith.cmpi eq, %arg2, %c0_i32 : i32
    %1 = arith.extui %0 : i1 to i32
    %c0_i32_0 = arith.constant 0 : i32
    %2 = arith.cmpi ne, %1, %c0_i32_0 : i32
    scf.if %2 {
      %c0_10 = arith.constant 0 : index
      %c0_11 = arith.constant 0 : index
      %12 = vector.load %arg5[%c0_10, %c0_11] : memref<1x128xf32, #tpu.memory_space<vmem>>, vector<1x128xf32>
      %13 = vector.shape_cast %12 : vector<1x128xf32> to vector<1x128xf32>
      %14 = vector.broadcast %13 : vector<1x128xf32> to vector<8x128xf32>
      %c0_12 = arith.constant 0 : index
      %c0_13 = arith.constant 0 : index
      %15 = vector.load %arg7[%c0_12, %c0_13] : memref<8x128xf32, #tpu.memory_space<vmem>>, vector<8x128xf32>
      tpu.vector_store %arg7[%c0_12, %c0_13], %14 {strides = array<i32>} : memref<8x128xf32, #tpu.memory_space<vmem>>, vector<8x128xf32>,
    } else {
    }
    %c0 = arith.constant 0 : index
    %c0_1 = arith.constant 0 : index
    %3 = vector.load %arg7[%c0, %c0_1] : memref<8x128xf32, #tpu.memory_space<vmem>>, vector<8x128xf32>
    %c0_2 = arith.constant 0 : index
    %c0_3 = arith.constant 0 : index
    %4 = vector.load %arg3[%c0_2, %c0_3] : memref<8x128xbf16, #tpu.memory_space<vmem>>, vector<8x128xbf16>
    %c0_4 = arith.constant 0 : index
    %c0_5 = arith.constant 0 : index
    %5 = vector.load %arg4[%c0_4, %c0_5] : memref<128x128xbf16, #tpu.memory_space<vmem>>, vector<128x128xbf16>
    %cst = arith.constant dense<0.000000e+00> : vector<8x128xf32>
    %6 = tpu.matmul %4, %5, %cst {dimension_numbers = #tpu.dot_dimension_numbers<[1], [0], [0], [1], [0, 0, 1, 1], [], []>} : vector<8x128xbf16>, vector<128x128xbf16>, vector<8x128xf32> -> vector<8x128xf32>
    %7 = arith.addf %3, %6 : vector<8x128xf32>
    %c0_6 = arith.constant 0 : index
    %c0_7 = arith.constant 0 : index
    %8 = vector.load %arg7[%c0_6, %c0_7] : memref<8x128xf32, #tpu.memory_space<vmem>>, vector<8x128xf32>
    tpu.vector_store %arg7[%c0_6, %c0_7], %7 {strides = array<i32>} : memref<8x128xf32, #tpu.memory_space<vmem>>, vector<8x128xf32>,
    %c0_i32_8 = arith.constant 0 : i32
    %9 = arith.cmpi eq, %arg2, %c0_i32_8 : i32
    %10 = arith.extui %9 : i1 to i32
    %c0_i32_9 = arith.constant 0 : i32
    %11 = arith.cmpi ne, %10, %c0_i32_9 : i32
    scf.if %11 {
      %c0_10 = arith.constant 0 : index
      %c0_11 = arith.constant 0 : index
      %12 = vector.load %arg7[%c0_10, %c0_11] : memref<8x128xf32, #tpu.memory_space<vmem>>, vector<8x128xf32>
      %13 = arith.truncf %12 : vector<8x128xf32> to vector<8x128xbf16>
      %c0_12 = arith.constant 0 : index
      %c0_13 = arith.constant 0 : index
      %14 = vector.load %arg6[%c0_12, %c0_13] : memref<8x128xbf16, #tpu.memory_space<vmem>>, vector<8x128xbf16>
      tpu.vector_store %arg6[%c0_12, %c0_13], %13 {strides = array<i32>} : memref<8x128xbf16, #tpu.memory_space<vmem>>, vector<8x128xbf16>,
    } else {
    }
    return
  }
  func.func @transform_0(%arg0: i32, %arg1: i32, %arg2: i32) -> (i32, i32) {
    %c0_i32 = arith.constant 0 : i32
    return %arg0, %arg2 : i32, i32
  }
  func.func @transform_1(%arg0: i32, %arg1: i32, %arg2: i32) -> (i32, i32) {
    %c0_i32 = arith.constant 0 : i32
    return %arg2, %arg1 : i32, i32
  }
  func.func @transform_2(%arg0: i32, %arg1: i32, %arg2: i32) -> (i32, i32) {
    %c0_i32 = arith.constant 0 : i32
    %c0_i32_0 = arith.constant 0 : i32
    return %c0_i32, %arg1 : i32, i32
  }
  func.func @transform_3(%arg0: i32, %arg1: i32, %arg2: i32) -> (i32, i32) {
    %c0_i32 = arith.constant 0 : i32
    return %arg0, %arg1 : i32, i32
  }
}

</mosaic_0001>

<bundles_post_ra>
// kernel: tpu_custom_call.1
= control target key start
LH: loop header
LB: loop body
LE: loop exit
PB: predicated region body
PF: predicated region fallthrough
CT: control target
= control target key end

     0   :  { %8 = vsyncpa [#allocation4], 0  ;;  %s342_s0 = inlined_call_operand.hbm [shape: bf16[8,128], index: 0, kind: input, shape index: {}]   ;;  %s343_s1 = inlined_call_operand.hbm [shape: bf16[128,128], index: 1, kind: input, shape index: {}]   ;;  %s344_s2 = inlined_call_operand.vmem [shape: f32[1,128], index: 2, kind: input, shape index: {}]   ;;  %s345_s3 = inlined_call_operand.hbm [shape: bf16[8,128], index: 3, kind: output, shape index: {}]  }
   0x1   :  { %9 = vsyncpa [#allocation7], 0 }
   0x2   :  { %10 = vsyncpa [#allocation5], 0  ;;  %s303_s12 = smov [#allocation3]   ;;  %s304_s14 = smov [#allocation6]  }
   0x3   :  { %s17_s13 = sshll.u32 %s303_s12, 4  ;;  %s26_s15 = sshll.u32 %s304_s14, 4  ;;  %s18_s13 = int_to_ptr.vmem [resolvable:$true] %s17_s13  ;;  %s27_s15 = int_to_ptr.vmem [resolvable:$true] %s26_s15 }
   0x4   :  { %s245_s16 = scalar_lea.vmem %s18_s13, 64  ;;  %p250_p1 = scmp.lt.s32.totalorder %s18_s13, %s18_s13 }
   0x5   :  { %p246_p0 = scmp.ne.s32.totalorder %s18_s13, %s245_s16  ;;  %p251_p2 = scmp.lt.s32.totalorder %s245_s16, %s245_s16 }
   0x7   :  { %p252_p3 = por %p251_p2, %p250_p1 }
   0x9   :  { %p253_p4 = pnand %p252_p3, %p246_p0 }
   0xb   :  { %256 = shalt.err (!%p253_p4)
}
   0xc   :  { %20 = dma.hbm_to_vmem [thread:$0]  %s342_s0, 64, %s18_s13, [#allocation4]  }
   0xd   :  { %s265_s19 = scalar_lea.vmem %s27_s15, 1024  ;;  %p270_p6 = scmp.lt.s32.totalorder %s27_s15, %s27_s15 }
   0xe   :  { %p266_p5 = scmp.ne.s32.totalorder %s27_s15, %s265_s19  ;;  %p271_p7 = scmp.lt.s32.totalorder %s265_s19, %s265_s19 }
  0x10   :  { %p272_p8 = por %p271_p7, %p270_p6 }
  0x12   :  { %p273_p9 = pnand %p272_p8, %p266_p5 }
  0x14   :  { %276 = shalt.err (!%p273_p9)
}
  0x15   :  { %s305_s20 = smov 64   ;;  %s306_s21 = smov 4  }
  0x16   :  { %32 = dma.hbm_to_vmem [thread:$0]  %s343_s1, 1024, %s27_s15, [#allocation7], %s305_s20, %s305_s20, %s306_s21  }
  0x17   :  { %297 = dma.done.wait [#allocation4], 64  }
  0x18   :  { %298 = vsyncadd [#allocation4], 4294967232 }
  0x19   :  { %299 = dma.done.wait [#allocation7], 1024  }
  0x1a   :  { %300 = vsyncadd [#allocation7], 4294966272  ;;  %v307_v0 = vmov 0.0   ;;  %vm308_vm0 = vmmov 0   ;;  %v229_v1 = vld [vmem:[#allocation6 + $0x38] sm:$0xff]   ;;  %v230_v2 = vld [vmem:[#allocation6 + $0x30] sm:$0xff]  }
  0x1b   :  { %202 = vmatprep.subr.bf16.mxu0 %v307_v0  ;;  %218 = vmatprep.mubr.msk.bf16.mxu0 %vm308_vm0, %v307_v0  ;;  %v231_v3 = vld [vmem:[#allocation6 + $0x28] sm:$0xff]   ;;  %v232_v4 = vld [vmem:[#allocation6 + $0x20] sm:$0xff]   ;;  %v233_v5 = vld [vmem:[#allocation6 + $0x18] sm:$0xff]   ;;  %s309_s24 = smov [#allocation8]  }
  0x1c   :  { %203 = vmatpush3.bf16.msra.mxu0 %v229_v1  ;;  %v234_v6 = vld [vmem:[#allocation6 + $0x10] sm:$0xff]   ;;  %v235_v7 = vld [vmem:[#allocation6 + $0x8] sm:$0xff]   ;;  %v236_v8 = vld [vmem:[#allocation6] sm:$0xff]   ;;  %s174_s25 = sshll.u32 %s309_s24, 4  ;;  %s175_s25 = int_to_ptr.vmem [resolvable:$true] %s174_s25 }
  0x1d   :  { %204 = vmatprep.subr.bf16.mxu0 %v307_v0  ;;  %v55_v9 = vld [vmem:[#allocation3] sm:$0xf]  ;;  %s277_s26 = scalar_lea.vmem %s175_s25, 64  ;;  %p282_p11 = scmp.lt.s32.totalorder %s175_s25, %s175_s25 }
  0x1e   :  { %v184_v10 = vld [vmem:[%s344_s2] ss:$0 sm:$0xff]  ;;  %p278_p10 = scmp.ne.s32.totalorder %s175_s25, %s277_s26  ;;  %p283_p12 = scmp.lt.s32.totalorder %s277_s26, %s277_s26 }
  0x20   :  { %205 = vmatpush3.bf16.msra.mxu0 %v230_v2  ;;  %p284_p13 = por %p283_p12, %p282_p11 }
  0x21   :  { %206 = vmatprep.subr.bf16.mxu0 %v307_v0 }
  0x22   :  { %p285_p0 = pnand %p284_p13, %p278_p10 }
  0x24   :  { %207 = vmatpush3.bf16.msra.mxu0 %v231_v3 }
  0x25   :  { %208 = vmatprep.subr.bf16.mxu0 %v307_v0 }
  0x28   :  { %209 = vmatpush3.bf16.msra.mxu0 %v232_v4 }
  0x29   :  { %210 = vmatprep.subr.bf16.mxu0 %v307_v0 }
  0x2c   :  { %211 = vmatpush3.bf16.msra.mxu0 %v233_v5 }
  0x2d   :  { %212 = vmatprep.subr.bf16.mxu0 %v307_v0 }
  0x30   :  { %213 = vmatpush3.bf16.msra.mxu0 %v234_v6 }
  0x31   :  { %214 = vmatprep.subr.bf16.mxu0 %v307_v0 }
  0x34   :  { %215 = vmatpush3.bf16.msra.mxu0 %v235_v7 }
  0x35   :  { %216 = vmatprep.subr.bf16.mxu0 %v307_v0 }
  0x38   :  { %217 = vmatpush3.bf16.msra.mxu0 %v236_v8 }
  0x3b   :  { %219 = vmatmul.mubr.bf16.vlgmr.msra.gmra.mxu0 %v55_v9 }
  0xfb   :  { %v154_v11 = vpop.f32.mrf.mxu0 }
  0xfc   :  { %v160_v12 = vadd.f32 %v184_v10, %v154_v11 }
  0xfd   :  { %v220_v13 = vpop.f32.mrf.mxu0 }
  0xfe   :  { %v166_v14 = vpack.c.bf16 %v160_v12, %v160_v12 }
  0xff   :  { %v157_v15 = vpop.f32.mrf.mxu0 }
 0x100   :  { %167 = vst [vmem:[#allocation8] sm:$0xf] %v166_v14 }
 0x101   :  { %v221_v16 = vpop.f32.mrf.mxu0 }
 0x102   :  { %288 = shalt.err (!%p285_p0)
}
 0x103   :  { %177 = dma.vmem_to_hbm [thread:$0]  %s175_s25, 64, %s345_s3, [#allocation5]  }
 0x104   :  { %301 = dma.done.wait [#allocation5], 64  }
 0x105   :  { %302 = vsyncadd [#allocation5], 4294967232 }
 0x106   :  { %181 = vsyncpa [#allocation4], 1 }
 0x107   :  { %182 = vsyncpa [#allocation7], 1 }
 0x108   :  { %183 = vsyncpa [#allocation5], 1 }

</bundles_post_ra>
